<compile_context>
chip_gen: v7x
topology: tpu7x:2x2x1
jax: 0.10.0
libtpu: 0.0.40
codegen_flags: <defaults>
</compile_context>

<pallas_src>
import numpy as np
import jax
import jax.numpy as jnp
from jax import lax
from jax.experimental import pallas as pl
from jax.experimental.pallas import tpu as pltpu


# ---------------------------------------------------------------------------
# Kernel 1: fused Linear (x @ W.T + b); threshold = out.sum(axis=1).mean()
# Threshold scalar is emitted through SMEM (single scalar store, no padded
# (8,128) VMEM tile).  The matmul contracts directly on the shared IN axis via
# dot_general so the (OUT, IN) weight tile is never transposed in VMEM.
# ---------------------------------------------------------------------------
def linear_kernel(x_ref, w_ref, b_ref, out_ref, thr_ref):
    x = x_ref[...]                               # (B, IN)
    w = w_ref[...]                               # (OUT, IN)
    b = b_ref[...]                               # (1, OUT)
    out = lax.dot_general(
        x, w,
        dimension_numbers=(((1,), (1,)), ((), ())),
        preferred_element_type=jnp.float32,
    ) + b                                        # (B, OUT), f32
    out_ref[...] = out.astype(out_ref.dtype)
    # out.sum(axis=1).mean() == out.sum() / B  (threshold from f32 accumulator)
    thr_ref[0, 0] = jnp.sum(out) / out.shape[0]


def linear_with_threshold(x, w, b):
    B, IN = x.shape
    OUT = w.shape[0]
    return pl.pallas_call(
        linear_kernel,
        out_shape=(
            jax.ShapeDtypeStruct((B, OUT), jnp.float32),
            jax.ShapeDtypeStruct((1, 1), jnp.float32),
        ),
        in_specs=[
            pl.BlockSpec(memory_space=pltpu.MemorySpace.VMEM),
            pl.BlockSpec(memory_space=pltpu.MemorySpace.VMEM),
            pl.BlockSpec(memory_space=pltpu.MemorySpace.VMEM),
        ],
        out_specs=(
            pl.BlockSpec(memory_space=pltpu.MemorySpace.VMEM),
            pl.BlockSpec(memory_space=pltpu.MemorySpace.SMEM),
        ),
    )(x, w, b.reshape(1, OUT))


# ---------------------------------------------------------------------------
# Kernel 2: elementwise comparison  (mask > threshold)  -> int8 {0,1}
# Pure HBM-bandwidth-bound stream.  int8 output cuts writeback (and the later
# device->host copy) 4x vs int32.  The threshold comes in via SMEM (scalar
# path), not as a padded VMEM tile.  The leading axis is blocked by 4 to
# amortize the ~0.35us/step overhead while keeping the double-buffered
# working set small enough for v7x's 64 MiB VMEM at full (500^3) scale.
# The grid axis stays "parallel" so v7x's two TensorCores both drive DMA.
# ---------------------------------------------------------------------------
def compare_kernel(mask_ref, thr_ref, gt_ref):
    t = thr_ref[0, 0]
    gt_ref[...] = (mask_ref[...] > t).astype(jnp.int8)


def mask_compare(mask, thr, block_m0=4):
    M0, M1, M2 = mask.shape
    bm = min(block_m0, M0)
    return pl.pallas_call(
        compare_kernel,
        out_shape=jax.ShapeDtypeStruct((M0, M1, M2), jnp.int8),
        grid=(pl.cdiv(M0, bm),),
        in_specs=[
            pl.BlockSpec((bm, M1, M2), lambda i: (i, 0, 0)),
            pl.BlockSpec(memory_space=pltpu.MemorySpace.SMEM),
        ],
        out_specs=pl.BlockSpec((bm, M1, M2), lambda i: (i, 0, 0)),
        compiler_params=pltpu.CompilerParams(
            dimension_semantics=("parallel",),
            vmem_limit_bytes=64 << 20,   # headroom for larger blocks on v5e
        ),
    )(mask, thr)


# ---------------------------------------------------------------------------
# Module-equivalent forward
# ---------------------------------------------------------------------------
def my_module_forward(x, mask, w, b):
    out, thr = linear_with_threshold(x, w, b)
    gt = mask_compare(mask, thr)
    # TODO(synk): torch's `.nonzero(as_tuple=True)` has a data-dependent output
    # shape that cannot be a static-shaped Pallas output; the boolean predicate
    # is computed on-device (int8) and index extraction is done host-side.
    hi_idx = np.nonzero(np.asarray(gt))
    return out, hi_idx


if __name__ == "__main__":
    # Scaled-down shapes consistent with the module:
    #   input (128, 500) -> (8, 32);  Linear(500, 10) -> Linear(32, 16)
    #   mask (500, 500, 500) -> (16, 16, 16)
    B, IN, OUT, M = 8, 32, 16, 16

    key = jax.random.PRNGKey(0)
    kx, km, kw, kb = jax.random.split(key, 4)

    x = jax.random.uniform(kx, (B, IN), dtype=jnp.float32)
    mask = jax.random.uniform(km, (M, M, M), dtype=jnp.float32)

    # Deterministic Linear parameters (nn.Linear-style uniform init bound).
    bound = 1.0 / np.sqrt(IN)
    w = jax.random.uniform(kw, (OUT, IN), dtype=jnp.float32,
                           minval=-bound, maxval=bound)
    b = jax.random.uniform(kb, (OUT,), dtype=jnp.float32,
                           minval=-bound, maxval=bound)

    out, hi_idx = my_module_forward(x, mask, w, b)
    jax.block_until_ready(out)

    # Sanity check against a plain-JAX reference.
    out_ref = x @ w.T + b
    thr_ref = out_ref.sum(axis=1).mean()
    hi_idx_ref = np.nonzero(np.asarray(mask) > float(thr_ref))
    assert np.allclose(np.asarray(out), np.asarray(out_ref), atol=1e-5)
    assert len(hi_idx) == len(hi_idx_ref)
    assert all(np.array_equal(a, r) for a, r in zip(hi_idx, hi_idx_ref))

    print("KERNEL_OK")
</pallas_src>

<mosaic_0001>
module attributes {stable_mosaic.version = 11 : i64} {
  func.func @linear_kernel(%arg0: memref<8x32xf32, #tpu.memory_space<vmem>>, %arg1: memref<16x32xf32, #tpu.memory_space<vmem>>, %arg2: memref<1x16xf32, #tpu.memory_space<vmem>>, %arg3: memref<8x16xf32, #tpu.memory_space<vmem>>, %arg4: memref<1x1xf32, #tpu.memory_space<smem>>) attributes {dimension_semantics = [], scalar_prefetch = 0 : i64, scratch_operands = 0 : i64, tpu.core_type = #tpu.core_type<tc>} {
    %c0 = arith.constant 0 : index
    %c0_0 = arith.constant 0 : index
    %0 = vector.load %arg0[%c0, %c0_0] : memref<8x32xf32, #tpu.memory_space<vmem>>, vector<8x32xf32>
    %c0_1 = arith.constant 0 : index
    %c0_2 = arith.constant 0 : index
    %1 = vector.load %arg1[%c0_1, %c0_2] : memref<16x32xf32, #tpu.memory_space<vmem>>, vector<16x32xf32>
    %c0_3 = arith.constant 0 : index
    %c0_4 = arith.constant 0 : index
    %2 = vector.load %arg2[%c0_3, %c0_4] : memref<1x16xf32, #tpu.memory_space<vmem>>, vector<1x16xf32>
    %cst = arith.constant dense<0.000000e+00> : vector<8x16xf32>
    %3 = tpu.matmul %0, %1, %cst {dimension_numbers = #tpu.dot_dimension_numbers<[1], [1], [0], [0], [0, 0, 1, 0], [], []>} : vector<8x32xf32>, vector<16x32xf32>, vector<8x16xf32> -> vector<8x16xf32>
    %4 = vector.broadcast %2 : vector<1x16xf32> to vector<8x16xf32>
    %5 = arith.addf %3, %4 : vector<8x16xf32>
    %c0_5 = arith.constant 0 : index
    %c0_6 = arith.constant 0 : index
    %6 = vector.load %arg3[%c0_5, %c0_6] : memref<8x16xf32, #tpu.memory_space<vmem>>, vector<8x16xf32>
    tpu.vector_store %arg3[%c0_5, %c0_6], %5 {strides = array<i32>} : memref<8x16xf32, #tpu.memory_space<vmem>>, vector<8x16xf32>,
    %7 = vector.shape_cast %5 : vector<8x16xf32> to vector<1x8x16xf32>
    %cst_7 = arith.constant dense<0.000000e+00> : vector<1xf32>
    %8 = vector.multi_reduction <add>, %7, %cst_7 [1, 2] : vector<1x8x16xf32> to vector<1xf32>
    %9 = vector.shape_cast %8 : vector<1xf32> to vector<1x1x1xf32>
    %10 = vector.extract %9[0, 0, 0] : f32 from vector<1x1x1xf32>
    %cst_8 = arith.constant 8.000000e+00 : f32
    %11 = arith.divf %10, %cst_8 : f32
    %c0_9 = arith.constant 0 : index
    %c0_10 = arith.constant 0 : index
    %12 = memref.load %arg4[%c0_9, %c0_10] : memref<1x1xf32, #tpu.memory_space<smem>>
    memref.store %11, %arg4[%c0_9, %c0_10] : memref<1x1xf32, #tpu.memory_space<smem>>
    return
  }
}

</mosaic_0001>

<bundles_post_ra>
// kernel: tpu_custom_call.1
= control target key start
LH: loop header
LB: loop body
LE: loop exit
PB: predicated region body
PF: predicated region fallthrough
CT: control target
= control target key end

     0   :  { %10 = vsyncpa [#allocation3], 0  ;;  %s385_s0 = inlined_call_operand.hbm [shape: f32[8,32], index: 0, kind: input, shape index: {}]   ;;  %s386_s1 = inlined_call_operand.hbm [shape: f32[16,32], index: 1, kind: input, shape index: {}]   ;;  %s387_s2 = inlined_call_operand.vmem [shape: f32[1,16], index: 2, kind: input, shape index: {}]   ;;  %s388_s3 = inlined_call_operand.hbm [shape: f32[8,16], index: 3, kind: output, shape index: {0}]   ;;  %s389_s4 = inlined_call_operand.hbm [shape: f32[1,1], index: 4, kind: output, shape index: {1}]  }
   0x1   :  { %11 = vsyncpa [#allocation7], 0 }
   0x2   :  { %12 = vsyncpa [#allocation4], 0 }
   0x3   :  { %13 = vsyncpa [#allocation5], 0  ;;  %s293_s15 = smov [#allocation2]   ;;  %s294_s17 = smov [#allocation6]  }
   0x4   :  { %s20_s16 = sshll.u32 %s293_s15, 4  ;;  %s29_s18 = sshll.u32 %s294_s17, 4  ;;  %s21_s16 = int_to_ptr.vmem [resolvable:$true] %s20_s16  ;;  %s327_s18 = int_to_ptr.vmem [resolvable:$true] %s29_s18 }
   0x5   :  { %s209_s21 = scalar_lea.hbm %s385_s0, 128 }
   0x6   :  { %p210_p0 = scmp.ne.s32.totalorder %s385_s0, %s209_s21  ;;  %p213_p1 = scmp.lt.u32.totalorder %s209_s21, %s385_s0 }
   0x8   :  { %p215_p2 = pnand %p213_p1, %p210_p0 }
   0xa   :  { %218 = shalt.err (!%p215_p2)
}
   0xb   :  { %s219_s26 = scalar_lea.vmem %s21_s16, 128  ;;  %p224_p4 = scmp.lt.s32.totalorder %s21_s16, %s21_s16 }
   0xc   :  { %p220_p3 = scmp.ne.s32.totalorder %s21_s16, %s219_s26  ;;  %p225_p5 = scmp.lt.s32.totalorder %s219_s26, %s219_s26 }
   0xe   :  { %p226_p6 = por %p225_p5, %p224_p4 }
  0x10   :  { %p227_p7 = pnand %p226_p6, %p220_p3 }
  0x12   :  { %230 = shalt.err (!%p227_p7)
}
  0x13   :  { %23 = dma.hbm_to_vmem [thread:$0]  %s385_s0, 128, %s21_s16, [#allocation3]  }
  0x14   :  { %s231_s5 = scalar_lea.hbm %s386_s1, 256 }
  0x15   :  { %p232_p8 = scmp.ne.s32.totalorder %s386_s1, %s231_s5  ;;  %p235_p9 = scmp.lt.u32.totalorder %s231_s5, %s386_s1 }
  0x17   :  { %p237_p10 = pnand %p235_p9, %p232_p8 }
  0x19   :  { %240 = shalt.err (!%p237_p10)
}
  0x1a   :  { %s241_s10 = scalar_lea.vmem %s327_s18, 256  ;;  %p246_p12 = scmp.lt.s32.totalorder %s327_s18, %s327_s18 }
  0x1b   :  { %p242_p11 = scmp.ne.s32.totalorder %s327_s18, %s241_s10  ;;  %p247_p13 = scmp.lt.s32.totalorder %s241_s10, %s241_s10 }
  0x1d   :  { %p248_p0 = por %p247_p13, %p246_p12 }
  0x1f   :  { %p249_p1 = pnand %p248_p0, %p242_p11 }
  0x21   :  { %252 = shalt.err (!%p249_p1)
}
  0x22   :  { %s295_s0 = smov 128   ;;  %s296_s11 = smov 8  }
  0x23   :  { %35 = dma.hbm_to_vmem [thread:$0]  %s386_s1, 256, %s327_s18, [#allocation7], %s295_s0, %s295_s0, %s296_s11  }
  0x24   :  { %285 = dma.done.wait [#allocation3], 128  }
  0x25   :  { %286 = vsyncadd [#allocation3], 4294967168 }
  0x26   :  { %287 = dma.done.wait [#allocation7], 256  }
  0x27   :  { %288 = vsyncadd [#allocation7], 4294967040  ;;  %v297_v0 = vmov 0.0|0.0   ;;  %vm298_vm0 = vmmov 0   ;;  %v299_v1 = vmov 0.0   ;;  %vm54_vm1 = vcmask 261120  }
  0x28   :  { %194 = vmatprep.subr.bf16.mxu0 %v297_v0  ;;  %191 = vmatprep.mubr.msk.f32.mxu0 %vm298_vm0, %v299_v1  ;;  %v45_v2 = vld [vmem:[#allocation6] sm:$0xff]  ;;  %v46_v3 = vld [vmem:[#allocation6 + $0x8] sm:$0xff]  ;;  %vm196_vm2 = vmpackc.low %vm54_vm1, %vm54_vm1  ;;  %vm134_vm3 = vcmask 130048   ;;  %s300_s1 = smov [#allocation8]  }
  0x29   :  { %v195_v4 = vpack.c.bf16 %v46_v3, %v45_v2  ;;  %v44_v5 = vld [vmem:[#allocation2] sm:$0xff]  ;;  %s157_s16 = sshll.u32 %s300_s1, 4  ;;  %s158_s16 = int_to_ptr.vmem [resolvable:$true] %s157_s16 }
  0x2a   :  { %v180_v6 = vld [vmem:[%s387_s2] ss:$0 sm:$0xff]  ;;  %s253_s17 = scalar_lea.vmem %s158_s16, 128  ;;  %p258_p3 = scmp.lt.s32.totalorder %s158_s16, %s158_s16 }
  0x2b   :  { %197 = vmatpush3.bf16.xpose.msk.msra.mxu0 %vm196_vm2, %v195_v4  ;;  %p254_p2 = scmp.ne.s32.totalorder %s158_s16, %s253_s17  ;;  %p259_p4 = scmp.lt.s32.totalorder %s253_s17, %s253_s17 }
  0x2d   :  { %p260_p5 = por %p259_p4, %p258_p3 }
  0x2f   :  { %p261_p6 = pnand %p260_p5, %p254_p2 }
  0x32   :  { %192 = vmatmul.mubr.msk.f32.vlgmr.msra.gmra.mrb[0].mxu0 %vm54_vm1, %v44_v5 }
 0x105   :  { %v130_v7 = vpop.f32.mrb[0].mxu0 }
 0x106   :  { %v131_v8 = vadd.f32 %v180_v6, %v130_v7  ;;  %v193_v9 = vpop.f32.mrb[1].mxu0 }
 0x108   :  { %v136_v10 = vsel %vm134_vm3, %v131_v8, 0.0  ;;  %135 = vst.msk [vmem:[#allocation8] sm:$0xff] %vm134_vm3, %v131_v8 }
 0x109   :  { %137 = vadd.xlane.f32.xlu0 %v136_v10 }
 0x10a   :  { %264 = shalt.err (!%p261_p6)
}
 0x10b   :  { %s265_s2 = scalar_lea.hbm %s388_s3, 128 }
 0x10c   :  { %p266_p7 = scmp.ne.s32.totalorder %s388_s3, %s265_s2  ;;  %p269_p8 = scmp.lt.u32.totalorder %s265_s2, %s388_s3 }
 0x10e   :  { %p271_p9 = pnand %p269_p8, %p266_p7 }
 0x110   :  { %274 = shalt.err (!%p271_p9)
}
 0x111   :  { %160 = dma.vmem_to_hbm [thread:$0]  %s158_s16, 128, %s388_s3, [#allocation4]  }
 0x112   :  { %s275_s30 = scalar_lea.hbm %s389_s4, 16 }
 0x113   :  { %p276_p10 = scmp.ne.s32.totalorder %s389_s4, %s275_s30  ;;  %p279_p11 = scmp.lt.u32.totalorder %s275_s30, %s389_s4 }
 0x115   :  { %p281_p12 = pnand %p279_p11, %p276_p10 }
 0x196   :  { %v138_v11 = vpop.xlane.xlu0 %137 }
 0x197   :  { %v139_v12 = vrot.slane %v138_v11, 4 }
 0x199   :  { %v140_v13 = vadd.f32 %v139_v12, %v138_v11 }
 0x19b   :  { %v141_v14 = vrot.slane %v140_v13, 2 }
 0x19d   :  { %v142_v15 = vadd.f32 %v141_v14, %v140_v13 }
 0x19f   :  { %v143_v16 = vrot.slane %v142_v15, 1 }
 0x1a1   :  { %v144_v17 = vadd.f32 %v143_v16, %v142_v15 }
 0x1a3   :  { %198 = vpush %v144_v17 }
 0x1d4   :  { %s199_s26 = spop %198 }
 0x1d5   :  { %s148_s27 = smul.f32 0.125, %s199_s26 }
 0x1d7   :  { %150 = sst [smem:[#allocation9]] %s148_s27 }
 0x1d8   :  { %284 = shalt.err (!%p281_p12)
}
 0x1d9   :  { %s301_s8 = smov [#allocation9]  }
 0x1da   :  { %168 = dma.smem_to_hbm %s301_s8, 16, %s389_s4, [#allocation5]  }
 0x1db   :  { %289 = dma.done.wait [#allocation4], 128  }
 0x1dc   :  { %290 = vsyncadd [#allocation4], 4294967168 }
 0x1dd   :  { %291 = dma.done.wait [#allocation5], 16  }
 0x1de   :  { %292 = vsyncadd [#allocation5], 4294967280 }
 0x1df   :  { %175 = sfence }
 0x1e0   :  { %176 = vsyncpa [#allocation3], 1 }
 0x1e1   :  { %177 = vsyncpa [#allocation7], 1 }
 0x1e2   :  { %178 = vsyncpa [#allocation4], 1 }
 0x1e3   :  { %179 = vsyncpa [#allocation5], 1 }

</bundles_post_ra>
